<compile_context>
chip_gen: v7x
topology: tpu7x:2x2x1
jax: 0.10.0
libtpu: 0.0.40
codegen_flags: <defaults>
</compile_context>

<pallas_src>
import math

import jax
import jax.numpy as jnp
from jax import lax
from jax.experimental import pallas as pl
from jax.experimental.pallas import tpu as pltpu


# ---------------------------------------------------------------------------
# Kernels
# ---------------------------------------------------------------------------

def _make_fused_kernel(temperature, tau_plus, batch_size):
    inv_t = float(1.0 / temperature)
    n_neg = float(batch_size - 1)
    clamp_min = float(n_neg * math.e ** (-1.0 / temperature))
    inv_one_minus_tau = float(1.0 / (1.0 - tau_plus))
    b = batch_size

    def kernel(img_ref, txt_ref, o_ref, sim_acc):
        k = pl.program_id(0)

        @pl.when(k == 0)
        def _init():
            sim_acc[...] = jnp.zeros_like(sim_acc)

        # Pure-MXU steady state: contract the feature axis of both operands
        # (no transpose), accumulate in f32.
        sim_acc[...] += lax.dot_general(
            img_ref[...], txt_ref[...],
            dimension_numbers=(((1,), (1,)), ((), ())),
            preferred_element_type=jnp.float32)

        @pl.when(k == pl.num_programs(0) - 1)
        def _finalize():
            sim = sim_acc[...]                                   # [B, B] f32

            # diag(sim) once, via iota mask (no per-step work, no B x B eye in HBM).
            row_ids = lax.broadcasted_iota(jnp.int32, (b, b), 0)
            col_ids = lax.broadcasted_iota(jnp.int32, (b, b), 1)
            diag_masked = jnp.where(row_ids == col_ids, sim, 0.0)
            diag_row = jnp.sum(diag_masked, axis=1, keepdims=True)  # [B, 1]
            diag_col = jnp.sum(diag_masked, axis=0, keepdims=True)  # [1, B]

            e = jnp.exp(sim * inv_t)                             # [B, B]
            pos_row = jnp.exp(diag_row * inv_t)                  # [B, 1]
            pos_col = jnp.exp(diag_col * inv_t)                  # [1, B]

            row_sum = jnp.sum(e, axis=1, keepdims=True)          # [B, 1] lane reduce
            col_sum = jnp.sum(e, axis=0, keepdims=True)          # [1, B] sublane (VALU) reduce

            neg1 = row_sum - pos_row
            neg2 = col_sum - pos_col
            ng1 = jnp.maximum(
                (neg1 - tau_plus * n_neg * pos_row) * inv_one_minus_tau, clamp_min)
            ng2 = jnp.maximum(
                (neg2 - tau_plus * n_neg * pos_col) * inv_one_minus_tau, clamp_min)

            t1 = jnp.sum(-jnp.log(pos_row / (pos_row + ng1)))
            t2 = jnp.sum(-jnp.log(pos_col / (pos_col + ng2)))
            o_ref[0, 0] = 0.5 * (t1 + t2) / jnp.float32(batch_size)

    return kernel


def _make_row_kernel(temperature, tau_plus, batch_size, tile_rows):
    inv_t = float(1.0 / temperature)
    n_neg = float(batch_size - 1)
    clamp_min = float(n_neg * math.e ** (-1.0 / temperature))
    inv_one_minus_tau = float(1.0 / (1.0 - tau_plus))

    def kernel(rows_ref, cols_ref, o_ref, sim_acc):
        i = pl.program_id(0)
        k = pl.program_id(1)

        @pl.when(k == 0)
        def _init():
            sim_acc[...] = jnp.zeros_like(sim_acc)

        sim_acc[...] += lax.dot_general(
            rows_ref[...], cols_ref[...],
            dimension_numbers=(((1,), (1,)), ((), ())),
            preferred_element_type=jnp.float32)

        # Per-row-block epilogue: pipelines against the next block's DMA/MXU.
        @pl.when(k == pl.num_programs(1) - 1)
        def _epilogue():
            sim = sim_acc[...]                                   # [tb, B] f32
            row_ids = (lax.broadcasted_iota(jnp.int32, (tile_rows, batch_size), 0)
                       + i * tile_rows)
            col_ids = lax.broadcasted_iota(jnp.int32, (tile_rows, batch_size), 1)
            diag = jnp.sum(jnp.where(row_ids == col_ids, sim, 0.0),
                           axis=1, keepdims=True)                # [tb, 1]

            e = jnp.exp(sim * inv_t)
            pos = jnp.exp(diag * inv_t)
            neg = jnp.sum(e, axis=1, keepdims=True) - pos
            ng = jnp.maximum((neg - tau_plus * n_neg * pos) * inv_one_minus_tau,
                             clamp_min)
            o_ref[...] = -jnp.log(pos / (pos + ng))              # per-row losses [tb, 1]

    return kernel


# ---------------------------------------------------------------------------
# Wrapper helpers
# ---------------------------------------------------------------------------

def _tpu_vmem_capacity_bytes():
    try:
        info = pltpu.get_tpu_info()
        cap = getattr(info, "vmem_capacity_bytes", None)
        if cap:
            return int(cap)
    except Exception:
        pass
    return 64 * 1024 * 1024  # conservative (v7x-sized) fallback


def _pick_tile_d(d, itemsize, resident_rows, budget_bytes):
    """Largest 128-multiple divisor of d whose double-buffered input tiles fit
    `budget_bytes`; prefer keeping >= 3 grid steps so DMA pipelines behind the
    MXU. Falls back to the full feature dim (single step) for small/awkward d."""
    divisors = [t for t in range(128, d + 1, 128) if d % t == 0]
    divisors.sort(reverse=True)
    best = None
    for t in divisors:
        if 2 * resident_rows * t * itemsize > budget_bytes:   # 2 pipeline buffers
            continue
        if best is None:
            best = t
        if d // t >= 3:
            return t
    return best if best is not None else d


def _vmem_limit_bytes(needed_bytes, capacity_bytes):
    limit = int(needed_bytes * 1.25) + (2 << 20)
    limit = max(limit, 16 << 20)
    limit = min(limit, int(capacity_bytes * 0.9))
    return limit


# ---------------------------------------------------------------------------
# Public wrapper
# ---------------------------------------------------------------------------

def dcl_loss_pallas(image_features, text_features, *, temperature=0.01,
                    tau_plus=0.1, cast_inputs_to_bf16=True,
                    force_row_tiling=False, row_tile=None):
    """Pallas TPU implementation of DCL_Loss.forward (world_size == 1)."""
    assert image_features.shape == text_features.shape
    assert image_features.ndim == 2
    b, d = image_features.shape

    # Feed the MXU bf16 (native rate everywhere, halves streaming HBM bytes);
    # accumulation stays f32 via preferred_element_type.
    if cast_inputs_to_bf16 and image_features.dtype == jnp.float32:
        image_features = image_features.astype(jnp.bfloat16)
        text_features = text_features.astype(jnp.bfloat16)
    itemsize = jnp.dtype(image_features.dtype).itemsize

    vmem_cap = _tpu_vmem_capacity_bytes()
    vmem_budget = int(0.8 * vmem_cap)

    sim_bytes_full = b * b * 4
    use_row_tiling = force_row_tiling or (sim_bytes_full > 24 * 1024 * 1024)
    if use_row_tiling and b % 128 != 0:
        # TODO(synk): pad the batch to a 128 multiple and mask padded rows; fall
        # back to the fused single-accumulator path for now.
        use_row_tiling = False

    if not use_row_tiling:
        # -------- fused path: one call, (B, B) f32 accumulator --------
        tile_d = _pick_tile_d(
            d, itemsize, resident_rows=2 * b,
            budget_bytes=max(vmem_budget - sim_bytes_full, 2 << 20))
        grid = (d // tile_d,)

        needed = (sim_bytes_full
                  + 2 * (2 * b) * tile_d * itemsize     # 2 inputs x 2 buffers
                  + (1 << 20))
        cost = pl.CostEstimate(
            flops=2 * b * b * d + 12 * b * b,
            transcendentals=b * b + 4 * b,
            bytes_accessed=2 * b * d * itemsize + 4,
        )

        out = pl.pallas_call(
            _make_fused_kernel(temperature, tau_plus, b),
            out_shape=jax.ShapeDtypeStruct((1, 1), jnp.float32),
            grid_spec=pltpu.PrefetchScalarGridSpec(
                num_scalar_prefetch=0,
                grid=grid,
                in_specs=[
                    pl.BlockSpec((b, tile_d), lambda k: (0, k)),
                    pl.BlockSpec((b, tile_d), lambda k: (0, k)),
                ],
                out_specs=pl.BlockSpec(memory_space=pltpu.MemorySpace.SMEM),
                scratch_shapes=[pltpu.VMEM((b, b), jnp.float32)],
            ),
            compiler_params=pltpu.CompilerParams(
                dimension_semantics=("arbitrary",),
                vmem_limit_bytes=_vmem_limit_bytes(needed, vmem_cap),
            ),
            cost_estimate=cost,
        )(image_features, text_features)
        return out[0, 0]

    # -------- row-tiled path: (row-block, D-chunk) grid, two symmetric passes --------
    if row_tile is None:
        tb = 256 if (b % 256 == 0 and b > 256) else 128
    else:
        tb = int(row_tile)
    assert b % tb == 0, (b, tb)
    nb = b // tb

    acc_bytes = tb * b * 4
    tile_d = _pick_tile_d(
        d, itemsize, resident_rows=tb + b,
        budget_bytes=max(vmem_budget - acc_bytes, 2 << 20))
    nk = d // tile_d
    grid = (nb, nk)

    needed = (acc_bytes
              + 2 * (tb + b) * tile_d * itemsize        # 2 buffers per input
              + 2 * tb * 4 + (1 << 20))
    cost = pl.CostEstimate(
        flops=2 * b * b * d + 8 * b * b,
        transcendentals=b * b + 2 * b,
        bytes_accessed=(b * d + nb * b * d) * itemsize + b * 4,
    )

    call = pl.pallas_call(
        _make_row_kernel(temperature, tau_plus, b, tb),
        out_shape=jax.ShapeDtypeStruct((b, 1), jnp.float32),
        grid_spec=pltpu.PrefetchScalarGridSpec(
            num_scalar_prefetch=0,
            grid=grid,
            in_specs=[
                pl.BlockSpec((tb, tile_d), lambda i, k: (i, k)),   # row operand
                pl.BlockSpec((b, tile_d), lambda i, k: (0, k)),    # col operand (full rows)
            ],
            out_specs=pl.BlockSpec((tb, 1), lambda i, k: (i, 0)),
            scratch_shapes=[pltpu.VMEM((tb, b), jnp.float32)],
        ),
        compiler_params=pltpu.CompilerParams(
            dimension_semantics=("parallel", "arbitrary"),
            vmem_limit_bytes=_vmem_limit_bytes(needed, vmem_cap),
        ),
        cost_estimate=cost,
    )

    # Pass 1: rows of sim (term 1).  Pass 2: operands swapped -> rows of sim.T,
    # i.e. column sums of exp(sim) (term 2).  Each pass is purely row-local.
    per_row_1 = call(image_features, text_features)
    per_row_2 = call(text_features, image_features)
    return 0.5 * (jnp.sum(per_row_1) + jnp.sum(per_row_2)) / jnp.float32(b)


# ---------------------------------------------------------------------------
# Pure-JAX reference (mirrors the PyTorch forward, world_size == 1)
# ---------------------------------------------------------------------------

def _dcl_loss_ref(image_features, text_features, temperature=0.01, tau_plus=0.1):
    img = image_features.astype(jnp.float32)
    txt = text_features.astype(jnp.float32)
    sim = img @ txt.T
    b = sim.shape[0]
    n = b - 1
    diag = jnp.diagonal(sim)
    pos = jnp.exp(diag / temperature)
    mask = 1.0 - jnp.eye(b, dtype=jnp.float32)
    neg1 = jnp.exp(sim / temperature) * mask
    neg2 = jnp.exp(sim.T / temperature) * mask
    clamp_min = n * math.e ** (-1.0 / temperature)
    ng1 = (-tau_plus * n * pos + neg1.sum(axis=-1)) / (1.0 - tau_plus)
    ng1 = jnp.maximum(ng1, clamp_min)
    ng2 = (-tau_plus * n * pos + neg2.sum(axis=-1)) / (1.0 - tau_plus)
    ng2 = jnp.maximum(ng2, clamp_min)
    return (0.5 * jnp.mean(-jnp.log(pos / (pos + ng1)))
            + 0.5 * jnp.mean(-jnp.log(pos / (pos + ng2))))


# ---------------------------------------------------------------------------
# Self-test
# ---------------------------------------------------------------------------

if __name__ == "__main__":
    key = jax.random.PRNGKey(0)

    def make_inputs(k, b, d):
        k1, k2 = jax.random.split(k)
        img = jax.random.normal(k1, (b, d), dtype=jnp.float32)
        txt = jax.random.normal(k2, (b, d), dtype=jnp.float32)
        # L2-normalized features (usual contrastive setup) keep exp(sim/T) finite.
        img = img / jnp.linalg.norm(img, axis=-1, keepdims=True)
        txt = txt / jnp.linalg.norm(txt, axis=-1, keepdims=True)
        return img, txt

    temperature, tau_plus = 0.5, 0.1

    def check(img, txt, **kw):
        loss = jax.block_until_ready(
            dcl_loss_pallas(img, txt, temperature=temperature,
                            tau_plus=tau_plus, **kw))
        # Reference in f32 on the same bf16-quantized inputs the kernel feeds
        # to the MXU (isolates kernel error from input quantization).
        img_q = img.astype(jnp.bfloat16).astype(jnp.float32)
        txt_q = txt.astype(jnp.bfloat16).astype(jnp.float32)
        ref = _dcl_loss_ref(img_q, txt_q, temperature=temperature,
                            tau_plus=tau_plus)
        assert bool(jnp.isfinite(loss)), loss
        assert jnp.allclose(loss, ref, rtol=1e-2, atol=1e-2), (loss, ref)

    k1, k2, k3 = jax.random.split(key, 3)

    # Case 1: fused path, tiny shape, single-trip grid (block == full array).
    check(*make_inputs(k1, 8, 32))

    # Case 2: fused path, streamed feature dim (3 chunks of 128 lanes).
    check(*make_inputs(k2, 16, 384))

    # Case 3: row-tiled path (2 row blocks x 4 feature chunks, parallel row
    # axis, two symmetric passes).
    check(*make_inputs(k3, 256, 512), force_row_tiling=True, row_tile=128)

    print("KERNEL_OK")
</pallas_src>

<mosaic_0001>
module attributes {stable_mosaic.version = 11 : i64} {
  func.func @kernel(%arg0: i32, %arg1: memref<8x32xbf16, #tpu.memory_space<vmem>>, %arg2: memref<8x32xbf16, #tpu.memory_space<vmem>>, %arg3: memref<1x1xf32, #tpu.memory_space<smem>>, %arg4: memref<8x8xf32, #tpu.memory_space<vmem>>) attributes {dimension_semantics = [#tpu.dimension_semantics<arbitrary>], iteration_bounds = array<i64: 1>, scalar_prefetch = 0 : i64, scratch_operands = 1 : i64, tpu.core_type = #tpu.core_type<tc>, window_params = [{transform_indices = @transform_0, window_bounds = array<i64: 8, 32>}, {transform_indices = @transform_1, window_bounds = array<i64: 8, 32>}, {transform_indices = @transform_2, window_bounds = array<i64: 1, 1>}]} {
    %c0_i32 = arith.constant 0 : i32
    %0 = arith.cmpi eq, %arg0, %c0_i32 : i32
    %1 = arith.extui %0 : i1 to i32
    %c0_i32_0 = arith.constant 0 : i32
    %2 = arith.cmpi ne, %1, %c0_i32_0 : i32
    scf.if %2 {
      %cst_10 = arith.constant 0.000000e+00 : f32
      %12 = vector.broadcast %cst_10 : f32 to vector<8x8xf32>
      %c0_11 = arith.constant 0 : index
      %c0_12 = arith.constant 0 : index
      %13 = vector.load %arg4[%c0_11, %c0_12] : memref<8x8xf32, #tpu.memory_space<vmem>>, vector<8x8xf32>
      tpu.vector_store %arg4[%c0_11, %c0_12], %12 {strides = array<i32>} : memref<8x8xf32, #tpu.memory_space<vmem>>, vector<8x8xf32>,
    } else {
    }
    %c0 = arith.constant 0 : index
    %c0_1 = arith.constant 0 : index
    %3 = vector.load %arg4[%c0, %c0_1] : memref<8x8xf32, #tpu.memory_space<vmem>>, vector<8x8xf32>
    %c0_2 = arith.constant 0 : index
    %c0_3 = arith.constant 0 : index
    %4 = vector.load %arg1[%c0_2, %c0_3] : memref<8x32xbf16, #tpu.memory_space<vmem>>, vector<8x32xbf16>
    %c0_4 = arith.constant 0 : index
    %c0_5 = arith.constant 0 : index
    %5 = vector.load %arg2[%c0_4, %c0_5] : memref<8x32xbf16, #tpu.memory_space<vmem>>, vector<8x32xbf16>
    %cst = arith.constant dense<0.000000e+00> : vector<8x8xf32>
    %6 = tpu.matmul %4, %5, %cst {dimension_numbers = #tpu.dot_dimension_numbers<[1], [1], [0], [0], [0, 0, 1, 0], [], []>} : vector<8x32xbf16>, vector<8x32xbf16>, vector<8x8xf32> -> vector<8x8xf32>
    %7 = arith.addf %3, %6 : vector<8x8xf32>
    %c0_6 = arith.constant 0 : index
    %c0_7 = arith.constant 0 : index
    %8 = vector.load %arg4[%c0_6, %c0_7] : memref<8x8xf32, #tpu.memory_space<vmem>>, vector<8x8xf32>
    tpu.vector_store %arg4[%c0_6, %c0_7], %7 {strides = array<i32>} : memref<8x8xf32, #tpu.memory_space<vmem>>, vector<8x8xf32>,
    %c0_i32_8 = arith.constant 0 : i32
    %9 = arith.cmpi eq, %arg0, %c0_i32_8 : i32
    %10 = arith.extui %9 : i1 to i32
    %c0_i32_9 = arith.constant 0 : i32
    %11 = arith.cmpi ne, %10, %c0_i32_9 : i32
    scf.if %11 {
      %c0_10 = arith.constant 0 : index
      %c0_11 = arith.constant 0 : index
      %12 = vector.load %arg4[%c0_10, %c0_11] : memref<8x8xf32, #tpu.memory_space<vmem>>, vector<8x8xf32>
      %13 = tpu.iota {dimensions = array<i32: 0>} : vector<8x8xi32>
      %14 = tpu.iota {dimensions = array<i32: 1>} : vector<8x8xi32>
      %15 = arith.cmpi eq, %13, %14 : vector<8x8xi32>
      %cst_12 = arith.constant 0.000000e+00 : f32
      %16 = vector.broadcast %cst_12 : f32 to vector<8x8xf32>
      %17 = arith.select %15, %12, %16 : vector<8x8xi1>, vector<8x8xf32>
      %cst_13 = arith.constant dense<0.000000e+00> : vector<8xf32>
      %18 = vector.multi_reduction <add>, %17, %cst_13 [1] : vector<8x8xf32> to vector<8xf32>
      %19 = vector.shape_cast %18 : vector<8xf32> to vector<8x1xf32>
      %cst_14 = arith.constant dense<0.000000e+00> : vector<8xf32>
      %20 = vector.multi_reduction <add>, %17, %cst_14 [0] : vector<8x8xf32> to vector<8xf32>
      %21 = vector.shape_cast %20 : vector<8xf32> to vector<1x8xf32>
      %cst_15 = arith.constant 2.000000e+00 : f32
      %22 = vector.broadcast %cst_15 : f32 to vector<8x8xf32>
      %23 = arith.mulf %12, %22 : vector<8x8xf32>
      %24 = math.exp %23 : vector<8x8xf32>
      %cst_16 = arith.constant 2.000000e+00 : f32
      %25 = vector.broadcast %cst_16 : f32 to vector<8x1xf32>
      %26 = arith.mulf %19, %25 : vector<8x1xf32>
      %27 = math.exp %26 : vector<8x1xf32>
      %cst_17 = arith.constant 2.000000e+00 : f32
      %28 = vector.broadcast %cst_17 : f32 to vector<1x8xf32>
      %29 = arith.mulf %21, %28 : vector<1x8xf32>
      %30 = math.exp %29 : vector<1x8xf32>
      %cst_18 = arith.constant dense<0.000000e+00> : vector<8xf32>
      %31 = vector.multi_reduction <add>, %24, %cst_18 [1] : vector<8x8xf32> to vector<8xf32>
      %32 = vector.shape_cast %31 : vector<8xf32> to vector<8x1xf32>
      %cst_19 = arith.constant dense<0.000000e+00> : vector<8xf32>
      %33 = vector.multi_reduction <add>, %24, %cst_19 [0] : vector<8x8xf32> to vector<8xf32>
      %34 = vector.shape_cast %33 : vector<8xf32> to vector<1x8xf32>
      %35 = arith.subf %32, %27 : vector<8x1xf32>
      %36 = arith.subf %34, %30 : vector<1x8xf32>
      %cst_20 = arith.constant 0.699999988 : f32
      %37 = vector.broadcast %cst_20 : f32 to vector<8x1xf32>
      %38 = arith.mulf %37, %27 : vector<8x1xf32>
      %39 = arith.subf %35, %38 : vector<8x1xf32>
      %cst_21 = arith.constant 1.11111116 : f32
      %40 = vector.broadcast %cst_21 : f32 to vector<8x1xf32>
      %41 = arith.mulf %39, %40 : vector<8x1xf32>
      %cst_22 = arith.constant 0.947346985 : f32
      %42 = vector.broadcast %cst_22 : f32 to vector<8x1xf32>
      %43 = arith.maximumf %41, %42 : vector<8x1xf32>
      %cst_23 = arith.constant 0.699999988 : f32
      %44 = vector.broadcast %cst_23 : f32 to vector<1x8xf32>
      %45 = arith.mulf %44, %30 : vector<1x8xf32>
      %46 = arith.subf %36, %45 : vector<1x8xf32>
      %cst_24 = arith.constant 1.11111116 : f32
      %47 = vector.broadcast %cst_24 : f32 to vector<1x8xf32>
      %48 = arith.mulf %46, %47 : vector<1x8xf32>
      %cst_25 = arith.constant 0.947346985 : f32
      %49 = vector.broadcast %cst_25 : f32 to vector<1x8xf32>
      %50 = arith.maximumf %48, %49 : vector<1x8xf32>
      %51 = arith.addf %27, %43 : vector<8x1xf32>
      %52 = arith.divf %27, %51 : vector<8x1xf32>
      %53 = math.log %52 : vector<8x1xf32>
      %cst_26 = arith.constant 0.000000e+00 : f32
      %54 = vector.broadcast %cst_26 : f32 to vector<8x1xf32>
      %55 = arith.subf %54, %53 : vector<8x1xf32>
      %56 = vector.shape_cast %55 : vector<8x1xf32> to vector<1x8x1xf32>
      %cst_27 = arith.constant dense<0.000000e+00> : vector<1xf32>
      %57 = vector.multi_reduction <add>, %56, %cst_27 [1, 2] : vector<1x8x1xf32> to vector<1xf32>
      %58 = vector.shape_cast %57 : vector<1xf32> to vector<1x1x1xf32>
      %59 = vector.extract %58[0, 0, 0] : f32 from vector<1x1x1xf32>
      %60 = arith.addf %30, %50 : vector<1x8xf32>
      %61 = arith.divf %30, %60 : vector<1x8xf32>
      %62 = math.log %61 : vector<1x8xf32>
      %cst_28 = arith.constant 0.000000e+00 : f32
      %63 = vector.broadcast %cst_28 : f32 to vector<1x8xf32>
      %64 = arith.subf %63, %62 : vector<1x8xf32>
      %65 = vector.shape_cast %64 : vector<1x8xf32> to vector<1x1x8xf32>
      %cst_29 = arith.constant dense<0.000000e+00> : vector<1xf32>
      %66 = vector.multi_reduction <add>, %65, %cst_29 [1, 2] : vector<1x1x8xf32> to vector<1xf32>
      %67 = vector.shape_cast %66 : vector<1xf32> to vector<1x1x1xf32>
      %68 = vector.extract %67[0, 0, 0] : f32 from vector<1x1x1xf32>
      %69 = arith.addf %59, %68 : f32
      %cst_30 = arith.constant 5.000000e-01 : f32
      %70 = arith.mulf %cst_30, %69 : f32
      %cst_31 = arith.constant 8.000000e+00 : f32
      %71 = arith.divf %70, %cst_31 : f32
      %c0_32 = arith.constant 0 : index
      %c0_33 = arith.constant 0 : index
      %72 = memref.load %arg3[%c0_32, %c0_33] : memref<1x1xf32, #tpu.memory_space<smem>>
      memref.store %71, %arg3[%c0_32, %c0_33] : memref<1x1xf32, #tpu.memory_space<smem>>
    } else {
    }
    return
  }
  func.func @transform_0(%arg0: i32) -> (i32, i32) {
    %c0_i32 = arith.constant 0 : i32
    %c0_i32_0 = arith.constant 0 : i32
    return %c0_i32, %arg0 : i32, i32
  }
  func.func @transform_1(%arg0: i32) -> (i32, i32) {
    %c0_i32 = arith.constant 0 : i32
    %c0_i32_0 = arith.constant 0 : i32
    return %c0_i32, %arg0 : i32, i32
  }
  func.func @transform_2(%arg0: i32) -> (i32, i32) {
    %c0_i32 = arith.constant 0 : i32
    %c0_i32_0 = arith.constant 0 : i32
    %c0_i32_1 = arith.constant 0 : i32
    return %c0_i32, %c0_i32_0 : i32, i32
  }
}

</mosaic_0001>

<bundles_post_ra>
// kernel: tpu_custom_call.1
= control target key start
LH: loop header
LB: loop body
LE: loop exit
PB: predicated region body
PF: predicated region fallthrough
CT: control target
= control target key end

     0   :  { %7 = vsyncpa [#allocation4], 0  ;;  %s351_s0 = inlined_call_operand.hbm [shape: bf16[8,32], index: 0, kind: input, shape index: {}]   ;;  %s352_s1 = inlined_call_operand.hbm [shape: bf16[8,32], index: 1, kind: input, shape index: {}]   ;;  %s353_s2 = inlined_call_operand.hbm [shape: f32[1,1], index: 2, kind: output, shape index: {}]  }
   0x1   :  { %8 = vsyncpa [#allocation7], 0 }
   0x2   :  { %9 = vsyncpa [#allocation5], 0  ;;  %s291_s9 = smov [#allocation3]   ;;  %s292_s11 = smov [#allocation6]  }
   0x3   :  { %s16_s10 = sshll.u32 %s291_s9, 4  ;;  %s26_s12 = sshll.u32 %s292_s11, 4  ;;  %s17_s10 = int_to_ptr.vmem [resolvable:$true] %s16_s10  ;;  %s27_s12 = int_to_ptr.vmem [resolvable:$true] %s26_s12 }
   0x4   :  { %s231_s15 = scalar_lea.hbm %s351_s0, 64 }
   0x5   :  { %p232_p0 = scmp.ne.s32.totalorder %s351_s0, %s231_s15  ;;  %p235_p1 = scmp.lt.u32.totalorder %s231_s15, %s351_s0 }
   0x7   :  { %p237_p2 = pnand %p235_p1, %p232_p0 }
   0x9   :  { %240 = shalt.err (!%p237_p2)
}
   0xa   :  { %s241_s20 = scalar_lea.vmem %s17_s10, 64  ;;  %p246_p4 = scmp.lt.s32.totalorder %s17_s10, %s17_s10 }
   0xb   :  { %p242_p3 = scmp.ne.s32.totalorder %s17_s10, %s241_s20  ;;  %p247_p5 = scmp.lt.s32.totalorder %s241_s20, %s241_s20 }
   0xd   :  { %p248_p6 = por %p247_p5, %p246_p4 }
   0xf   :  { %p249_p7 = pnand %p248_p6, %p242_p3 }
  0x11   :  { %252 = shalt.err (!%p249_p7)
}
  0x12   :  { %19 = dma.hbm_to_vmem [thread:$0]  %s351_s0, 64, %s17_s10, [#allocation4]  }
  0x13   :  { %s253_s25 = scalar_lea.hbm %s352_s1, 64 }
  0x14   :  { %p254_p8 = scmp.ne.s32.totalorder %s352_s1, %s253_s25  ;;  %p257_p9 = scmp.lt.u32.totalorder %s253_s25, %s352_s1 }
  0x16   :  { %p259_p10 = pnand %p257_p9, %p254_p8 }
  0x18   :  { %262 = shalt.err (!%p259_p10)
}
  0x19   :  { %s263_s30 = scalar_lea.vmem %s27_s12, 64  ;;  %p268_p12 = scmp.lt.s32.totalorder %s27_s12, %s27_s12 }
  0x1a   :  { %p264_p11 = scmp.ne.s32.totalorder %s27_s12, %s263_s30  ;;  %p269_p13 = scmp.lt.s32.totalorder %s263_s30, %s263_s30 }
  0x1c   :  { %p270_p0 = por %p269_p13, %p268_p12 }
  0x1e   :  { %p271_p1 = pnand %p270_p0, %p264_p11 }
  0x20   :  { %274 = shalt.err (!%p271_p1)
}
  0x21   :  { %29 = dma.hbm_to_vmem [thread:$0]  %s352_s1, 64, %s27_s12, [#allocation7]  }
  0x22   :  { %285 = dma.done.wait [#allocation4], 64  }
  0x23   :  { %286 = vsyncadd [#allocation4], 4294967232 }
  0x24   :  { %287 = dma.done.wait [#allocation7], 64  }
  0x25   :  { %288 = vsyncadd [#allocation7], 4294967232  ;;  %vm41_vm0 = vcmask 64512   ;;  %v293_v0 = vmov 0.0   ;;  %vm294_vm1 = vmmov 0   ;;  %vm46_vm2 = vcmask 261120  }
  0x26   :  { %42 = vst.msk [vmem:[#allocation2] sm:$0xff] %vm41_vm0, %v293_v0  ;;  %202 = vmatprep.subr.bf16.mxu0 %v293_v0  ;;  %204 = vmatprep.mubr.msk.bf16.mxu0 %vm294_vm1, %v293_v0  ;;  %v45_v1 = vld [vmem:[#allocation6] sm:$0xf]  ;;  %v44_v3 = vld [vmem:[#allocation3] sm:$0xf]  ;;  %v100_v6 = vlaneseq  ;;  %vm149_vm4 = vcmask 7168  }
  0x27   :  { %v51_v2 = vsel %vm46_vm2, %v45_v1, 0  ;;  %vm166_vm5 = vcmask 57344   ;;  %s275_s10 = scalar_lea.hbm %s353_s2, 16 }
  0x28   :  { %203 = vmatpush3.bf16.xpose.msra.mxu0 %v51_v2  ;;  %v101_v11 = vshrl.u32 %v100_v6, 7  ;;  %v103_v12 = vand.u32 127, %v100_v6  ;;  %p276_p2 = scmp.ne.s32.totalorder %s353_s2, %s275_s10  ;;  %p279_p3 = scmp.lt.u32.totalorder %s275_s10, %s353_s2 }
  0x2a   :  { %vm104_vm3 = vcmp.eq.s32.totalorder %v101_v11, %v103_v12  ;;  %p281_p4 = pnand %p279_p3, %p276_p2 }
  0x2d   :  { %v43_v4 = vld [vmem:[#allocation2] sm:$0xff] }
  0x2f   :  { %205 = vmatmul.mubr.msk.bf16.vlgmr.msra.gmra.mrb[0].mxu0 %vm46_vm2, %v44_v3 }
 0x102   :  { %v87_v5 = vpop.f32.mrb[0].mxu0 }
 0x103   :  { %v93_v7 = vadd.f32 %v87_v5, %v43_v4  ;;  %v206_v8 = vpop.f32.mrb[1].mxu0 }
 0x104   :  { %v90_v9 = vpop.f32.mrb[2].mxu0 }
 0x105   :  { %95 = vst.msk [vmem:[#allocation2] sm:$0xff] %vm41_vm0, %v93_v7  ;;  %v207_v10 = vpop.f32.mrb[3].mxu0 }
 0x10c   :  { %v99_v13 = vld [vmem:[#allocation2] sm:$0xff] }
 0x10d   :  { %v105_v14 = vsel %vm104_vm3, %v99_v13, 0.0  ;;  %v115_v15 = vmul.f32 2.0, %v99_v13 }
 0x10e   :  { %v106_v16 = vsel %vm41_vm0, %v105_v14, 0.0 }
 0x10f   :  { %v116_v17 = vmul.f32 1.442695, %v115_v15  ;;  %107 = vadd.xlane.f32.xlu0 %v106_v16  ;;  %v109_v18 = vrot.slane %v106_v16, 4 }
 0x111   :  { %217 = vpow2.f32 %v116_v17  ;;  %v110_v19 = vadd.f32 %v109_v18, %v106_v16 }
 0x113   :  { %v111_v20 = vrot.slane %v110_v19, 2 }
 0x115   :  { %v112_v21 = vadd.f32 %v111_v20, %v110_v19 }
 0x117   :  { %v113_v22 = vrot.slane %v112_v21, 1 }
 0x119   :  { %v114_v23 = vadd.f32 %v113_v22, %v112_v21 }
 0x11b   :  { %v218_v24 = vpop.eup %217  ;;  %v121_v25 = vmul.f32 2.0, %v114_v23 }
 0x11c   :  { %v124_v26 = vsel %vm41_vm0, %v218_v24, 0.0 }
 0x11d   :  { %v122_v27 = vmul.f32 1.442695, %v121_v25  ;;  %v127_v28 = vrot.slane %v124_v26, 4  ;;  %125 = vadd.xlane.f32.xlu0 %v124_v26 }
 0x11f   :  { %219 = vpow2.f32 %v122_v27  ;;  %v128_v29 = vadd.f32 %v127_v28, %v124_v26 }
 0x121   :  { %v129_v30 = vrot.slane %v128_v29, 2 }
 0x123   :  { %v130_v31 = vadd.f32 %v129_v30, %v128_v29 }
 0x125   :  { %v131_v32 = vrot.slane %v130_v31, 1 }
 0x127   :  { %v132_v33 = vadd.f32 %v131_v32, %v130_v31 }
 0x129   :  { %v220_v34 = vpop.eup %219 }
 0x12a   :  { %v134_v35 = vsub.f32 %v132_v33, %v220_v34  ;;  %v139_v36 = vmul.f32 0.7, %v220_v34 }
 0x12c   :  { %v140_v37 = vsub.f32 %v134_v35, %v139_v36 }
 0x12e   :  { %v141_v38 = vmul.f32 1.1111112, %v140_v37 }
 0x130   :  { %v142_v39 = vmax.f32 %v141_v38, 0.947347 }
 0x132   :  { %v160_v40 = vadd.f32 %v220_v34, %v142_v39 }
 0x134   :  { %221 = vrcp.f32 %v160_v40 }
 0x13e   :  { %v222_v41 = vpop.eup %221 }
 0x13f   :  { %v162_v42 = vmul.f32 %v222_v41, %v220_v34 }
 0x19c   :  { %v108_v43 = vpop.xlane.xlu0 %107 }
 0x19d   :  { %v118_v44 = vmul.f32 2.0, %v108_v43 }
 0x19f   :  { %v119_v45 = vmul.f32 1.442695, %v118_v44 }
 0x1a1   :  { %223 = vpow2.f32 %v119_v45 }
 0x1aa   :  { %v126_v46 = vpop.xlane.xlu0 %125 }
 0x1ab   :  { %v224_v47 = vpop.eup %223 }
 0x1ac   :  { %v135_v48 = vmul.f32 0.7, %v224_v47  ;;  %v133_v49 = vsub.f32 %v126_v46, %v224_v47 }
 0x1ae   :  { %v136_v50 = vsub.f32 %v133_v49, %v135_v48 }
 0x1b0   :  { %v137_v51 = vmul.f32 1.1111112, %v136_v50 }
 0x1b2   :  { %v138_v52 = vmax.f32 %v137_v51, 0.947347 }
 0x1b4   :  { %v143_v53 = vadd.f32 %v224_v47, %v138_v52 }
 0x1b6   :  { %225 = vrcp.f32 %v143_v53 }
 0x1b7   :  { %227 = vlog2.f32 %v162_v42 }
 0x1c0   :  { %v226_v54 = vpop.eup %225 }
 0x1c1   :  { %v145_v55 = vmul.f32 %v226_v54, %v224_v47  ;;  %v228_v56 = vpop.eup %227 }
 0x1c2   :  { %v164_v59 = vmul.f32 0.6931472, %v228_v56 }
 0x1c3   :  { %229 = vlog2.f32 %v145_v55 }
 0x1c4   :  { %v165_v62 = vsub.f32 0.0, %v164_v59 }
 0x1c6   :  { %v167_v63 = vsel %vm166_vm5, %v165_v62, 0.0 }
 0x1cd   :  { %v230_v57 = vpop.eup %229 }
 0x1ce   :  { %v147_v58 = vmul.f32 0.6931472, %v230_v57 }
 0x1d0   :  { %v148_v60 = vsub.f32 0.0, %v147_v58 }
 0x1d2   :  { %v150_v61 = vsel %vm149_vm4, %v148_v60, 0.0 }
 0x1d3   :  { %151 = vadd.xlane.f32.xlu1 %v150_v61 }
 0x1d7   :  { %168 = vadd.xlane.f32.xlu1 %v167_v63 }
 0x260   :  { %v152_v0 = vpop.xlane.xlu1 %151 }
 0x261   :  { %v153_v1 = vrot.slane %v152_v0, 4 }
 0x263   :  { %v154_v2 = vadd.f32 %v153_v1, %v152_v0 }
 0x264   :  { %v169_v3 = vpop.xlane.xlu1 %168 }
 0x265   :  { %v155_v4 = vrot.slane %v154_v2, 2  ;;  %v170_v5 = vrot.slane %v169_v3, 4 }
 0x267   :  { %v171_v6 = vadd.f32 %v170_v5, %v169_v3  ;;  %v156_v7 = vadd.f32 %v155_v4, %v154_v2 }
 0x269   :  { %v172_v8 = vrot.slane %v171_v6, 2  ;;  %v157_v9 = vrot.slane %v156_v7, 1 }
 0x26b   :  { %v173_v10 = vadd.f32 %v172_v8, %v171_v6  ;;  %v158_v11 = vadd.f32 %v157_v9, %v156_v7 }
 0x26d   :  { %208 = vpush %v158_v11  ;;  %v174_v12 = vrot.slane %v173_v10, 1 }
 0x26f   :  { %v175_v13 = vadd.f32 %v174_v12, %v173_v10 }
 0x271   :  { %210 = vpush %v175_v13 }
 0x29e   :  { %s209_s1 = spop %208 }
 0x2a2   :  { %s211_s4 = spop %210 }
 0x2a3   :  { %s177_s5 = sadd.f32 %s211_s4, %s209_s1 }
 0x2a5   :  { %s178_s6 = smul.f32 0.5, %s177_s5 }
 0x2a7   :  { %s181_s7 = smul.f32 0.125, %s178_s6 }
 0x2a9   :  { %183 = sst [smem:[#allocation8]] %s181_s7 }
 0x2aa   :  { %284 = shalt.err (!%p281_p4)
}
 0x2ab   :  { %s295_s15 = smov [#allocation8]  }
 0x2ac   :  { %191 = dma.smem_to_hbm %s295_s15, 16, %s353_s2, [#allocation5]  }
 0x2ad   :  { %289 = dma.done.wait [#allocation5], 16  }
 0x2ae   :  { %290 = vsyncadd [#allocation5], 4294967280 }
 0x2af   :  { %195 = sfence }
 0x2b0   :  { %196 = vsyncpa [#allocation4], 1 }
 0x2b1   :  { %197 = vsyncpa [#allocation7], 1 }
 0x2b2   :  { %198 = vsyncpa [#allocation5], 1 }

</bundles_post_ra>
